<compile_context>
chip_gen: v6e
topology: v6e:2x2x1
jax: 0.10.0
libtpu: 0.0.40
codegen_flags: <defaults>
</compile_context>

<pallas_src>
import functools

import jax
import jax.numpy as jnp
from jax.experimental import pallas as pl
from jax.experimental.pallas import tpu as pltpu


def _st_gen_conv_kernel(x_ref, w1_ref, b1_ref, wt_ref, o_ref, *,
                        T, Kt, VO, apply_final_relu):
    NT = x_ref.shape[0]
    pad = (Kt - 1) // 2

    x = x_ref[...]                                                  # (NT, VC) bf16

    # ---- fused (GCN ⊗ A ⊗ BN1-scale | residual 1x1 ⊗ BN) matmul + fused bias ----
    hr = jnp.dot(x, w1_ref[...], preferred_element_type=jnp.float32) + b1_ref[...]
    h = jnp.maximum(hr[:, :VO], 0.0)                                # GCN -> BN1 -> ReLU
    out = hr[:, VO:]                                                # residual + all folded shifts

    # ---- fused temporal conv: one deep MXU push over all Kt taps ----
    y_all = jnp.dot(h.astype(wt_ref.dtype), wt_ref[...],
                    preferred_element_type=jnp.float32)             # (NT, Kt*VO)

    # Temporal shift via sublane roll + boundary mask (zero-padding + batch edges).
    t_idx = jax.lax.broadcasted_iota(jnp.int32, (NT, VO), 0) % T
    for dt in range(Kt):                                            # Kt static, unrolled
        d = dt - pad
        y = y_all[:, dt * VO:(dt + 1) * VO]                         # 128-lane aligned slice
        if d == 0:
            out = out + y
        else:
            shifted = pltpu.roll(y, shift=(-d) % NT, axis=0)        # out[r] <- y[r + d]
            mask = jnp.logical_and(t_idx + d >= 0, t_idx + d < T)
            out = out + jnp.where(mask, shifted, 0.0)

    if apply_final_relu:                                            # out_channels != 3 path
        out = jnp.maximum(out, 0.0)
    o_ref[...] = out.astype(o_ref.dtype)


def st_gen_conv_forward(x_nctv, A, params, *, Kt):
    """x_nctv: (N, Cin, T, V) float32 (PyTorch NCHW). A: (K, V, V). Returns (out_nctv, A)."""
    N, Cin, T, V = x_nctv.shape
    O = params['b_gcn'].shape[1]
    apply_final_relu = (O != 3)
    VC, VO = V * Cin, V * O
    NT = N * T

    s1, h1 = params['s1'][0], params['h1'][0]
    s2, h2 = params['s2'][0], params['h2'][0]
    sr, hr = params['sr'][0], params['hr'][0]

    # ---- wrapper-side weight/bias folding (tiny arrays, f32) ----
    # GCN ⊗ A ⊗ BN1-scale:  Mg[(v,c),(w,o)] = sum_k W_gcn[k,c,o] * A[k,v,w] * s1[o]
    Mg = (jnp.einsum('kco,kvw->vcwo', params['W_gcn'], A) * s1).reshape(VC, VO)
    # GCN bias folded through A and BN1 (per output vertex w -> (V, O) shift).
    shiftg = (jnp.einsum('kw,ko->wo', A.sum(axis=1), params['b_gcn']) * s1
              + h1).reshape(1, VO)

    eyeV = jnp.eye(V, dtype=jnp.float32)
    # Temporal tap weights, BN2-scaled, block-diagonal over vertices, concatenated
    # along the output axis: (VO, Kt*VO).
    # NOTE: for realistic ST-GCN sizes (large V*O) this kron materialization scales
    # as Kt*V^2*O^2 and should be replaced by a per-vertex dot_general.
    Wt_s = params['Wt'] * s2                                        # (Kt, O, O)
    Wt_bd = (eyeV[None, :, None, :, None] *
             Wt_s[:, None, :, None, :]).reshape(Kt, VO, VO)
    Wt_cat = jnp.transpose(Wt_bd, (1, 0, 2)).reshape(VO, Kt * VO)

    # Residual 1x1 conv, BN-scaled, block-diagonal: (VC, VO).
    Wr_s = params['Wr'] * sr                                        # (Cin, O)
    Wr_bd = (eyeV[:, None, :, None] * Wr_s[None, :, None, :]).reshape(VC, VO)

    # All remaining constant shifts merged into a single (1, VO) bias.
    bias_out = (jnp.tile(params['bt'][0] * s2 + h2, V) +
                jnp.tile(params['br'][0] * sr + hr, V)).reshape(1, VO)

    # Fused GCN|residual weight (VC, 2*VO) and bias (1, 2*VO).
    W1 = jnp.concatenate([Mg, Wr_bd], axis=1)
    b1 = jnp.concatenate([shiftg, bias_out], axis=1)

    # Lane-dense batch-merged input: (N*T, V*Cin), flattened index v*Cin + c.
    x2d = jnp.transpose(x_nctv, (0, 2, 3, 1)).reshape(NT, VC)

    # bf16 MXU operands; accumulation / biases / output stay f32.
    x_b = x2d.astype(jnp.bfloat16)
    W1_b = W1.astype(jnp.bfloat16)
    Wt_b = Wt_cat.astype(jnp.bfloat16)

    kernel = functools.partial(_st_gen_conv_kernel, T=T, Kt=Kt, VO=VO,
                               apply_final_relu=apply_final_relu)

    flops = 2 * NT * VC * (2 * VO) + 2 * NT * VO * (Kt * VO)
    bytes_accessed = (NT * VC * 2 + VC * 2 * VO * 2 + VO * Kt * VO * 2
                      + 2 * VO * 4 + NT * VO * 4)

    out = pl.pallas_call(
        kernel,
        out_shape=jax.ShapeDtypeStruct((NT, VO), x_nctv.dtype),
        grid=(1,),
        in_specs=[
            pl.BlockSpec((NT, VC), lambda i: (0, 0)),        # x (whole batch, one block)
            pl.BlockSpec((VC, 2 * VO), lambda i: (0, 0)),    # fused GCN | residual weight
            pl.BlockSpec((1, 2 * VO), lambda i: (0, 0)),     # fused bias / BN shifts
            pl.BlockSpec((VO, Kt * VO), lambda i: (0, 0)),   # fused temporal tap weight
        ],
        out_specs=pl.BlockSpec((NT, VO), lambda i: (0, 0)),
        compiler_params=pltpu.CompilerParams(
            dimension_semantics=("arbitrary",),
            vmem_limit_bytes=64 * 1024 * 1024),
        cost_estimate=pl.CostEstimate(flops=flops, transcendentals=0,
                                      bytes_accessed=bytes_accessed),
    )(x_b, W1_b, b1, Wt_b)

    out = out.reshape(N, T, V, O)
    return jnp.transpose(out, (0, 3, 1, 2)), A


def init_params(key, Cin, O, K, Kt):
    """Deterministic synthetic parameters (eval-mode BN folded into scale/shift)."""
    eps = 1e-5
    ks = jax.random.split(key, 20)

    def bn_fold(kg, kb, km, kv):
        gamma = 1.0 + 0.1 * jax.random.normal(kg, (O,), jnp.float32)
        beta = 0.1 * jax.random.normal(kb, (O,), jnp.float32)
        mean = 0.1 * jax.random.normal(km, (O,), jnp.float32)
        var = jnp.abs(1.0 + 0.1 * jax.random.normal(kv, (O,), jnp.float32))
        scale = gamma / jnp.sqrt(var + eps)
        shift = beta - mean * scale
        return scale.reshape(1, O), shift.reshape(1, O)

    params = {
        'W_gcn': 0.1 * jax.random.normal(ks[0], (K, Cin, O), jnp.float32),
        'b_gcn': 0.1 * jax.random.normal(ks[1], (K, O), jnp.float32),
        'Wt':    0.1 * jax.random.normal(ks[2], (Kt, O, O), jnp.float32),
        'bt':    0.1 * jax.random.normal(ks[3], (1, O), jnp.float32),
        'Wr':    0.1 * jax.random.normal(ks[4], (Cin, O), jnp.float32),
        'br':    0.1 * jax.random.normal(ks[5], (1, O), jnp.float32),
    }
    params['s1'], params['h1'] = bn_fold(ks[6], ks[7], ks[8], ks[9])
    params['s2'], params['h2'] = bn_fold(ks[10], ks[11], ks[12], ks[13])
    params['sr'], params['hr'] = bn_fold(ks[14], ks[15], ks[16], ks[17])
    return params


def ref_forward(x_nctv, A, p, Kt):
    """Pure-JAX (f32) reference of the same forward (for correctness check)."""
    N, Cin, T, V = x_nctv.shape
    O = p['b_gcn'].shape[1]
    x = jnp.transpose(x_nctv, (0, 2, 3, 1))                       # (N,T,V,Cin)
    h = jnp.einsum('ntvc,kco->nktvo', x, p['W_gcn']) + p['b_gcn'][None, :, None, None, :]
    agg = jnp.einsum('nktvo,kvw->ntwo', h, A)
    h = jnp.maximum(agg * p['s1'][0] + p['h1'][0], 0.0)
    pad = (Kt - 1) // 2
    hp = jnp.pad(h, ((0, 0), (pad, pad), (0, 0), (0, 0)))
    acc = jnp.zeros((N, T, V, O), jnp.float32) + p['bt'][0]
    for dt in range(Kt):
        acc = acc + jnp.einsum('ntvc,co->ntvo', hp[:, dt:dt + T], p['Wt'][dt])
    tcn = acc * p['s2'][0] + p['h2'][0]
    res = jnp.einsum('ntvc,co->ntvo', x, p['Wr']) + p['br'][0]
    res = res * p['sr'][0] + p['hr'][0]
    out = tcn + res
    if O != 3:
        out = jnp.maximum(out, 0.0)
    return jnp.transpose(out, (0, 3, 1, 2)), A


if __name__ == "__main__":
    N, Cin, O, T, V = 2, 4, 8, 16, 16
    K, Kt = 3, 3          # kernel_size = (Kt, K); Kt must be odd

    key = jax.random.PRNGKey(0)
    kx, kA, kp = jax.random.split(key, 3)
    x = jax.random.normal(kx, (N, Cin, T, V), jnp.float32)
    A = 0.2 * jnp.abs(jax.random.normal(kA, (K, V, V), jnp.float32))
    params = init_params(kp, Cin, O, K, Kt)

    out, A_out = st_gen_conv_forward(x, A, params, Kt=Kt)
    out = jax.block_until_ready(out)

    ref_out, _ = ref_forward(x, A, params, Kt)
    assert out.shape == (N, O, T, V)
    # Tolerance loosened vs v2 because matmul operands are bf16 (accumulation f32).
    assert jnp.allclose(out, ref_out, atol=3e-2, rtol=3e-2), "Pallas kernel mismatch vs reference"

    print("KERNEL_OK")
</pallas_src>

<mosaic_0001>
module attributes {stable_mosaic.version = 11 : i64} {
  func.func @_st_gen_conv_kernel(%arg0: i32, %arg1: memref<32x64xbf16, #tpu.memory_space<vmem>>, %arg2: memref<64x256xbf16, #tpu.memory_space<vmem>>, %arg3: memref<1x256xf32, #tpu.memory_space<vmem>>, %arg4: memref<128x384xbf16, #tpu.memory_space<vmem>>, %arg5: memref<32x128xf32, #tpu.memory_space<vmem>>) attributes {dimension_semantics = [#tpu.dimension_semantics<arbitrary>], iteration_bounds = array<i64: 1>, scalar_prefetch = 0 : i64, scratch_operands = 0 : i64, tpu.core_type = #tpu.core_type<tc>, window_params = [{pipeline_mode = #tpu.pipeline_mode<synchronous>, transform_indices = @transform_0, window_bounds = array<i64: 32, 64>}, {pipeline_mode = #tpu.pipeline_mode<synchronous>, transform_indices = @transform_1, window_bounds = array<i64: 64, 256>}, {pipeline_mode = #tpu.pipeline_mode<synchronous>, transform_indices = @transform_2, window_bounds = array<i64: 1, 256>}, {pipeline_mode = #tpu.pipeline_mode<synchronous>, transform_indices = @transform_3, window_bounds = array<i64: 128, 384>}, {pipeline_mode = #tpu.pipeline_mode<synchronous>, transform_indices = @transform_4, window_bounds = array<i64: 32, 128>}]} {
    %c0 = arith.constant 0 : index
    %c0_0 = arith.constant 0 : index
    %0 = vector.load %arg1[%c0, %c0_0] : memref<32x64xbf16, #tpu.memory_space<vmem>>, vector<32x64xbf16>
    %c0_1 = arith.constant 0 : index
    %c0_2 = arith.constant 0 : index
    %1 = vector.load %arg2[%c0_1, %c0_2] : memref<64x256xbf16, #tpu.memory_space<vmem>>, vector<64x256xbf16>
    %cst = arith.constant dense<0.000000e+00> : vector<32x256xf32>
    %2 = tpu.matmul %0, %1, %cst {dimension_numbers = #tpu.dot_dimension_numbers<[1], [0], [0], [1], [0, 0, 1, 1], [], []>} : vector<32x64xbf16>, vector<64x256xbf16>, vector<32x256xf32> -> vector<32x256xf32>
    %c0_3 = arith.constant 0 : index
    %c0_4 = arith.constant 0 : index
    %3 = vector.load %arg3[%c0_3, %c0_4] : memref<1x256xf32, #tpu.memory_space<vmem>>, vector<1x256xf32>
    %4 = vector.broadcast %3 : vector<1x256xf32> to vector<32x256xf32>
    %5 = arith.addf %2, %4 : vector<32x256xf32>
    %6 = vector.extract_strided_slice %5 {offsets = [0, 0], sizes = [32, 128], strides = [1, 1]} : vector<32x256xf32> to vector<32x128xf32>
    %cst_5 = arith.constant 0.000000e+00 : f32
    %7 = vector.broadcast %cst_5 : f32 to vector<32x128xf32>
    %8 = arith.maximumf %6, %7 : vector<32x128xf32>
    %9 = vector.extract_strided_slice %5 {offsets = [0, 128], sizes = [32, 128], strides = [1, 1]} : vector<32x256xf32> to vector<32x128xf32>
    %10 = arith.truncf %8 : vector<32x128xf32> to vector<32x128xbf16>
    %c0_6 = arith.constant 0 : index
    %c0_7 = arith.constant 0 : index
    %11 = vector.load %arg4[%c0_6, %c0_7] : memref<128x384xbf16, #tpu.memory_space<vmem>>, vector<128x384xbf16>
    %cst_8 = arith.constant dense<0.000000e+00> : vector<32x384xf32>
    %12 = tpu.matmul %10, %11, %cst_8 {dimension_numbers = #tpu.dot_dimension_numbers<[1], [0], [0], [1], [0, 0, 1, 1], [], []>} : vector<32x128xbf16>, vector<128x384xbf16>, vector<32x384xf32> -> vector<32x384xf32>
    %13 = tpu.iota {dimensions = array<i32: 0>} : vector<32x128xi32>
    %c16_i32 = arith.constant 16 : i32
    %c0_i32 = arith.constant 0 : i32
    %14 = arith.cmpi eq, %c16_i32, %c0_i32 : i32
    %c1_i32 = arith.constant 1 : i32
    %15 = arith.select %14, %c1_i32, %c16_i32 : i32
    %16 = vector.broadcast %15 : i32 to vector<32x128xi32>
    %17 = arith.remsi %13, %16 : vector<32x128xi32>
    %c0_i32_9 = arith.constant 0 : i32
    %18 = vector.broadcast %c0_i32_9 : i32 to vector<32x128xi32>
    %19 = arith.cmpi ne, %17, %18 : vector<32x128xi32>
    %c0_i32_10 = arith.constant 0 : i32
    %20 = vector.broadcast %c0_i32_10 : i32 to vector<32x128xi32>
    %21 = arith.cmpi slt, %17, %20 : vector<32x128xi32>
    %c0_i32_11 = arith.constant 0 : i32
    %22 = arith.cmpi slt, %15, %c0_i32_11 : i32
    %23 = vector.broadcast %22 : i1 to vector<32x128xi1>
    %24 = vector.broadcast %23 : vector<32x128xi1> to vector<32x128xi1>
    %25 = arith.xori %21, %24 : vector<32x128xi1>
    %26 = arith.andi %25, %19 : vector<32x128xi1>
    %27 = vector.broadcast %15 : i32 to vector<32x128xi32>
    %28 = arith.addi %17, %27 : vector<32x128xi32>
    %29 = arith.select %26, %28, %17 : vector<32x128xi1>, vector<32x128xi32>
    %30 = vector.extract_strided_slice %12 {offsets = [0, 0], sizes = [32, 128], strides = [1, 1]} : vector<32x384xf32> to vector<32x128xf32>
    %c1_i32_12 = arith.constant 1 : i32
    %31 = tpu.dynamic_rotate %30 by %c1_i32_12 dim 0 : vector<32x128xf32>, i32 -> vector<32x128xf32>
    %c-1_i32 = arith.constant -1 : i32
    %32 = vector.broadcast %c-1_i32 : i32 to vector<32x128xi32>
    %33 = arith.addi %29, %32 : vector<32x128xi32>
    %c0_i32_13 = arith.constant 0 : i32
    %34 = vector.broadcast %c0_i32_13 : i32 to vector<32x128xi32>
    %35 = arith.cmpi sge, %33, %34 : vector<32x128xi32>
    %c-1_i32_14 = arith.constant -1 : i32
    %36 = vector.broadcast %c-1_i32_14 : i32 to vector<32x128xi32>
    %37 = arith.addi %29, %36 : vector<32x128xi32>
    %c16_i32_15 = arith.constant 16 : i32
    %38 = vector.broadcast %c16_i32_15 : i32 to vector<32x128xi32>
    %39 = arith.cmpi slt, %37, %38 : vector<32x128xi32>
    %40 = arith.andi %35, %39 : vector<32x128xi1>
    %cst_16 = arith.constant 0.000000e+00 : f32
    %41 = vector.broadcast %cst_16 : f32 to vector<32x128xf32>
    %42 = arith.select %40, %31, %41 : vector<32x128xi1>, vector<32x128xf32>
    %43 = arith.addf %9, %42 : vector<32x128xf32>
    %44 = vector.extract_strided_slice %12 {offsets = [0, 128], sizes = [32, 128], strides = [1, 1]} : vector<32x384xf32> to vector<32x128xf32>
    %45 = arith.addf %43, %44 : vector<32x128xf32>
    %46 = vector.extract_strided_slice %12 {offsets = [0, 256], sizes = [32, 128], strides = [1, 1]} : vector<32x384xf32> to vector<32x128xf32>
    %c31_i32 = arith.constant 31 : i32
    %47 = tpu.dynamic_rotate %46 by %c31_i32 dim 0 : vector<32x128xf32>, i32 -> vector<32x128xf32>
    %c1_i32_17 = arith.constant 1 : i32
    %48 = vector.broadcast %c1_i32_17 : i32 to vector<32x128xi32>
    %49 = arith.addi %29, %48 : vector<32x128xi32>
    %c0_i32_18 = arith.constant 0 : i32
    %50 = vector.broadcast %c0_i32_18 : i32 to vector<32x128xi32>
    %51 = arith.cmpi sge, %49, %50 : vector<32x128xi32>
    %c1_i32_19 = arith.constant 1 : i32
    %52 = vector.broadcast %c1_i32_19 : i32 to vector<32x128xi32>
    %53 = arith.addi %29, %52 : vector<32x128xi32>
    %c16_i32_20 = arith.constant 16 : i32
    %54 = vector.broadcast %c16_i32_20 : i32 to vector<32x128xi32>
    %55 = arith.cmpi slt, %53, %54 : vector<32x128xi32>
    %56 = arith.andi %51, %55 : vector<32x128xi1>
    %cst_21 = arith.constant 0.000000e+00 : f32
    %57 = vector.broadcast %cst_21 : f32 to vector<32x128xf32>
    %58 = arith.select %56, %47, %57 : vector<32x128xi1>, vector<32x128xf32>
    %59 = arith.addf %45, %58 : vector<32x128xf32>
    %cst_22 = arith.constant 0.000000e+00 : f32
    %60 = vector.broadcast %cst_22 : f32 to vector<32x128xf32>
    %61 = arith.maximumf %59, %60 : vector<32x128xf32>
    %c0_23 = arith.constant 0 : index
    %c0_24 = arith.constant 0 : index
    %62 = vector.load %arg5[%c0_23, %c0_24] : memref<32x128xf32, #tpu.memory_space<vmem>>, vector<32x128xf32>
    tpu.vector_store %arg5[%c0_23, %c0_24], %61 {strides = array<i32>} : memref<32x128xf32, #tpu.memory_space<vmem>>, vector<32x128xf32>,
    return
  }
  func.func @transform_0(%arg0: i32) -> (i32, i32) {
    %c0_i32 = arith.constant 0 : i32
    %c0_i32_0 = arith.constant 0 : i32
    %c0_i32_1 = arith.constant 0 : i32
    return %c0_i32, %c0_i32_0 : i32, i32
  }
  func.func @transform_1(%arg0: i32) -> (i32, i32) {
    %c0_i32 = arith.constant 0 : i32
    %c0_i32_0 = arith.constant 0 : i32
    %c0_i32_1 = arith.constant 0 : i32
    return %c0_i32, %c0_i32_0 : i32, i32
  }
  func.func @transform_2(%arg0: i32) -> (i32, i32) {
    %c0_i32 = arith.constant 0 : i32
    %c0_i32_0 = arith.constant 0 : i32
    %c0_i32_1 = arith.constant 0 : i32
    return %c0_i32, %c0_i32_0 : i32, i32
  }
  func.func @transform_3(%arg0: i32) -> (i32, i32) {
    %c0_i32 = arith.constant 0 : i32
    %c0_i32_0 = arith.constant 0 : i32
    %c0_i32_1 = arith.constant 0 : i32
    return %c0_i32, %c0_i32_0 : i32, i32
  }
  func.func @transform_4(%arg0: i32) -> (i32, i32) {
    %c0_i32 = arith.constant 0 : i32
    %c0_i32_0 = arith.constant 0 : i32
    %c0_i32_1 = arith.constant 0 : i32
    return %c0_i32, %c0_i32_0 : i32, i32
  }
}

</mosaic_0001>

<bundles_post_ra>
// kernel: tpu_custom_call.1
= control target key start
LH: loop header
LB: loop body
LE: loop exit
PB: predicated region body
PF: predicated region fallthrough
CT: control target
= control target key end

     0   :  { %9 = vsyncpa [#allocation3], 0  ;;  %s915_s0 = inlined_call_operand.hbm [shape: bf16[32,64], index: 0, kind: input, shape index: {}]   ;;  %s916_s1 = inlined_call_operand.hbm [shape: bf16[64,256], index: 1, kind: input, shape index: {}]   ;;  %s917_s2 = inlined_call_operand.vmem [shape: f32[1,256], index: 2, kind: input, shape index: {}]   ;;  %s918_s3 = inlined_call_operand.hbm [shape: bf16[128,384], index: 3, kind: input, shape index: {}]   ;;  %s919_s4 = inlined_call_operand.hbm [shape: f32[32,128], index: 4, kind: output, shape index: {}]  }
   0x1   :  { %10 = vsyncpa [#allocation6], 0 }
   0x2   :  { %11 = vsyncpa [#allocation4], 0  ;;  %s820_s15 = smov [#allocation5]  }
   0x3   :  { %s29_s16 = sshll.u32 %s820_s15, 4  ;;  %s30_s16 = int_to_ptr.vmem [resolvable:$true] %s29_s16 }
   0x4   :  { %s742_s17 = scalar_lea.vmem %s30_s16, 1024  ;;  %p747_p1 = scmp.lt.s32.totalorder %s30_s16, %s30_s16 }
   0x5   :  { %p743_p0 = scmp.ne.s32.totalorder %s30_s16, %s742_s17  ;;  %p748_p2 = scmp.lt.s32.totalorder %s742_s17, %s742_s17 }
   0x7   :  { %p749_p3 = por %p748_p2, %p747_p1 }
   0x9   :  { %p750_p4 = pnand %p749_p3, %p743_p0 }
   0xb   :  { %753 = shalt.err (!%p750_p4)
}
   0xc   :  { %s821_s18 = smov 128   ;;  %s822_s19 = smov 8  }
   0xd   :  { %35 = dma.hbm_to_vmem [thread:$0]  %s916_s1, 1024, %s30_s16, [#allocation6], %s821_s18, %s821_s18, %s822_s19  }
   0xe   :  { %s823_s22 = smov [#allocation2]  }
   0xf   :  { %s17_s23 = sshll.u32 %s823_s22, 4  ;;  %s18_s23 = int_to_ptr.vmem [resolvable:$true] %s17_s23 }
  0x10   :  { %s762_s24 = scalar_lea.vmem %s18_s23, 256  ;;  %p767_p6 = scmp.lt.s32.totalorder %s18_s23, %s18_s23 }
  0x11   :  { %p763_p5 = scmp.ne.s32.totalorder %s18_s23, %s762_s24  ;;  %p768_p7 = scmp.lt.s32.totalorder %s762_s24, %s762_s24 }
  0x13   :  { %p769_p8 = por %p768_p7, %p767_p6 }
  0x15   :  { %p770_p9 = pnand %p769_p8, %p763_p5 }
  0x17   :  { %773 = shalt.err (!%p770_p9)
}
  0x18   :  { %s824_s25 = smov 64   ;;  %s825_s26 = smov 4  }
  0x19   :  { %23 = dma.hbm_to_vmem [thread:$0]  %s915_s0, 256, %s18_s23, [#allocation3], %s824_s25, %s824_s25, %s825_s26  }
  0x1a   :  { %s826_s29 = smov [#allocation7]  }
  0x1b   :  { %s43_s30 = sshll.u32 %s826_s29, 4  ;;  %s44_s30 = int_to_ptr.vmem [resolvable:$true] %s43_s30 }
  0x1c   :  { %s782_s1 = scalar_lea.vmem %s44_s30, 3072  ;;  %p787_p11 = scmp.lt.s32.totalorder %s44_s30, %s44_s30 }
  0x1d   :  { %p783_p10 = scmp.ne.s32.totalorder %s44_s30, %s782_s1  ;;  %p788_p12 = scmp.lt.s32.totalorder %s782_s1, %s782_s1 }
  0x1f   :  { %p789_p13 = por %p788_p12, %p787_p11 }
  0x21   :  { %p790_p0 = pnand %p789_p13, %p783_p10 }
  0x23   :  { %793 = shalt.err (!%p790_p0)
}
  0x24   :  { %s827_s5 = smov 192   ;;  %s828_s6 = smov 12  }
  0x25   :  { %49 = dma.hbm_to_vmem [thread:$0]  %s918_s3, 3072, %s44_s30, [#allocation6], %s827_s5, %s827_s5, %s828_s6  }
  0x26   :  { %814 = dma.done.wait [#allocation3], 256  }
  0x27   :  { %815 = vsyncadd [#allocation3], 4294967040 }
  0x28   :  { %816 = dma.done.wait [#allocation6], 4096  }
  0x29   :  { %817 = vsyncadd [#allocation6], 4294963200  ;;  %v829_v0 = vmov 0   ;;  %v688_v1 = vld [vmem:[#allocation5 + $0x34] ss:$8 sps:$4 sm:$0xff]   ;;  %vm134_vm0 = vcmask 523264   ;;  %v74_v35 = vlaneseq }
  0x2a   :  { %173 = vmatprep.mubr.bf16.mxu0 %v829_v0  ;;  %392 = vmatprep.mubr.bf16.mxu1 %v829_v0  ;;  %v690_v2 = vld [vmem:[#allocation5 + $0x30] ss:$8 sps:$4 sm:$0xff]   ;;  %v691_v3 = vld [vmem:[#allocation5 + $0x24] ss:$8 sps:$4 sm:$0xff]   ;;  %v693_v4 = vld [vmem:[#allocation5 + $0x20] ss:$8 sps:$4 sm:$0xff]  }
  0x2b   :  { %149 = vmatprep.subr.bf16.mxu0 %v688_v1  ;;  %v694_v5 = vld [vmem:[#allocation5 + $0x14] ss:$8 sps:$4 sm:$0xff]   ;;  %v696_v6 = vld [vmem:[#allocation5 + $0x10] ss:$8 sps:$4 sm:$0xff]   ;;  %v697_v7 = vld [vmem:[#allocation5 + $0x4] ss:$8 sps:$4 sm:$0xff]  }
  0x2c   :  { %150 = vmatpush1.bf16.msra.mxu0 %v690_v2  ;;  %v702_v8 = vld [vmem:[#allocation7 + $0xac] ss:$12 sps:$4 sm:$0xff]   ;;  %v704_v9 = vld [vmem:[#allocation7 + $0xa8] ss:$12 sps:$4 sm:$0xff]   ;;  %v707_v12 = vld [vmem:[#allocation7 + $0x90] ss:$12 sps:$4 sm:$0xff]  }
  0x2d   :  { %151 = vmatprep.subr.bf16.mxu0 %v691_v3  ;;  %v699_v10 = vld [vmem:[#allocation5] ss:$8 sps:$4 sm:$0xff]   ;;  %360 = vmatprep.subr.bf16.mxu1 %v702_v8  ;;  %v710_v14 = vld [vmem:[#allocation7 + $0xb0] ss:$12 sps:$4 sm:$0xff]   ;;  %v711_v16 = vld [vmem:[#allocation7 + $0x78] ss:$12 sps:$4 sm:$0xff]  }
  0x2e   :  { %v705_v11 = vld [vmem:[#allocation7 + $0x94] ss:$12 sps:$4 sm:$0xff]   ;;  %361 = vmatpush1.bf16.msra.mxu1 %v704_v9  ;;  %v708_v13 = vld [vmem:[#allocation7 + $0x7c] ss:$12 sps:$4 sm:$0xff]   ;;  %v712_v17 = vld [vmem:[#allocation7 + $0x64] ss:$12 sps:$4 sm:$0xff]  }
  0x2f   :  { %362 = vmatprep.subr.bf16.mxu1 %v705_v11  ;;  %v700_v15 = vld [vmem:[#allocation2] sm:$0xff]   ;;  %v714_v18 = vld [vmem:[#allocation7 + $0x98] ss:$12 sps:$4 sm:$0xff]   ;;  %v715_v19 = vld [vmem:[#allocation7 + $0x60] ss:$12 sps:$4 sm:$0xff]   ;;  %v873_v36 = vshrl.u32 %v74_v35, 7 }
  0x30   :  { %152 = vmatpush1.bf16.msra.mxu0 %v693_v4  ;;  %v716_v20 = vld [vmem:[#allocation7 + $0x4c] ss:$12 sps:$4 sm:$0xff]   ;;  %v719_v23 = vld [vmem:[#allocation7 + $0x48] ss:$12 sps:$4 sm:$0xff]   ;;  %v723_v26 = vld [vmem:[#allocation7 + $0x30] ss:$12 sps:$4 sm:$0xff]  }
  0x31   :  { %153 = vmatprep.subr.bf16.mxu0 %v694_v5  ;;  %v718_v21 = vld [vmem:[#allocation7 + $0x80] ss:$12 sps:$4 sm:$0xff]   ;;  %v701_v22 = vld [vmem:[#allocation2 + $0x8] sm:$0xff]   ;;  %v722_v25 = vld [vmem:[#allocation7 + $0x68] ss:$12 sps:$4 sm:$0xff]   ;;  %v76_v37 = vsub.s32 0, %v873_v36 }
  0x32   :  { %363 = vmatpush1.bf16.msra.mxu1 %v707_v12  ;;  %v720_v24 = vld [vmem:[#allocation7 + $0x34] ss:$12 sps:$4 sm:$0xff]   ;;  %v724_v27 = vld [vmem:[#allocation7 + $0x1c] ss:$12 sps:$4 sm:$0xff]   ;;  %v727_v29 = vld [vmem:[#allocation7 + $0x18] ss:$12 sps:$4 sm:$0xff]  }
  0x33   :  { %364 = vmatprep.subr.bf16.mxu1 %v708_v13  ;;  %v726_v28 = vld [vmem:[#allocation7 + $0x50] ss:$12 sps:$4 sm:$0xff]   ;;  %v730_v31 = vld [vmem:[#allocation7 + $0x38] ss:$12 sps:$4 sm:$0xff]   ;;  %v731_v32 = vld [vmem:[#allocation7] ss:$12 sps:$4 sm:$0xff]  }
  0x34   :  { %154 = vmatpush1.bf16.msra.mxu0 %v696_v6  ;;  %v728_v30 = vld [vmem:[#allocation7 + $0x4] ss:$12 sps:$4 sm:$0xff]   ;;  %v732_v33 = vld [vmem:[#allocation7 + $0x20] ss:$12 sps:$4 sm:$0xff]   ;;  %v733_v34 = vld [vmem:[#allocation7 + $0x8] ss:$12 sps:$4 sm:$0xff]  }
  0x35   :  { %155 = vmatprep.subr.bf16.mxu0 %v697_v7  ;;  %v80_v38 = vsub.s32 1, %v873_v36  ;;  %v72_v39 = vld [vmem:[%s917_s2] sm:$0x3]  ;;  %v465_v62 = vadd.s32 16, %v873_v36  ;;  %v466_v3 = vadd.s32 24, %v873_v36  ;;  %v464_v4 = vadd.s32 8, %v873_v36 }
  0x36   :  { %365 = vmatpush1.bf16.msra.mxu1 %v711_v16  ;;  %v77_v40 = vrot.slane %v72_v39, %v76_v37  ;;  %v471_v6 = vand.u32 15, %v873_v36  ;;  %vm519_vm1 = vcmp.lt.s32.totalorder %v873_v36, 1  ;;  %vm556_vm4 = vcmp.lt.s32.totalorder %v873_v36, 7  ;;  %s830_s2 = smov [#allocation8]  }
  0x37   :  { %366 = vmatprep.subr.bf16.mxu1 %v712_v17  ;;  %v81_v41 = vrot.slane %v72_v39, %v80_v38  ;;  %v485_v1 = vand.u32 15, %v465_v62  ;;  %v492_v9 = vand.u32 15, %v466_v3  ;;  %s598_s9 = sshll.u32 %s830_s2, 4  ;;  %s599_s9 = int_to_ptr.vmem [resolvable:$true] %s598_s9 }
  0x38   :  { %156 = vmatpush1.bf16.msra.mxu0 %v699_v10  ;;  %v478_v10 = vand.u32 15, %v464_v4  ;;  %s794_s10 = scalar_lea.vmem %s599_s9, 512  ;;  %p799_p2 = scmp.lt.s32.totalorder %s599_s9, %s599_s9 }
  0x39   :  { %657 = vmatprep.subr.bf16.mxu0 %v710_v14  ;;  %v526_v7 = vadd.s32 4294967295, %v485_v1  ;;  %p795_p1 = scmp.ne.s32.totalorder %s599_s9, %s794_s10  ;;  %p800_p3 = scmp.lt.s32.totalorder %s794_s10, %s794_s10 }
  0x3a   :  { %367 = vmatpush1.bf16.msra.mxu1 %v715_v19  ;;  %v564_v19 = vadd.s32 1, %v492_v9 }
  0x3b   :  { %621 = vmatmul.mubr.msk.bf16.vlgmr.msra.gmra.mxu0 %vm134_vm0, %v700_v15  ;;  %368 = vmatprep.subr.bf16.mxu1 %v716_v20  ;;  %vm530_vm2 = vcmp.ge.s32.totalorder %v526_v7, 0  ;;  %v562_v20 = vadd.s32 1, %v478_v10  ;;  %p801_p4 = por %p800_p3, %p799_p2 }
  0x3c   :  { %183 = vmatprep.mubr.bf16.mxu0 %v829_v0  ;;  %658 = vmatpush3.bf16.msra.mxu0 %v710_v14  ;;  %v524_v14 = vadd.s32 4294967295, %v471_v6  ;;  %vm572_vm5 = vcmp.lt.s32.totalorder %v564_v19, 16 }
  0x3d   :  { %659 = vmatprep.subr.bf16.mxu0 %v714_v18  ;;  %vm570_vm6 = vcmp.lt.s32.totalorder %v562_v20, 16  ;;  %p802_p5 = pnand %p801_p4, %p795_p1 }
  0x3e   :  { %369 = vmatpush1.bf16.msra.mxu1 %v719_v23  ;;  %vm528_vm3 = vcmp.ge.s32.totalorder %v524_v14, 0 }
  0x3f   :  { %370 = vmatprep.subr.bf16.mxu1 %v720_v24 }
  0x40   :  { %660 = vmatpush3.bf16.msra.mxu0 %v714_v18 }
  0x41   :  { %661 = vmatprep.subr.bf16.mxu0 %v718_v21 }
  0x42   :  { %371 = vmatpush1.bf16.msra.mxu1 %v723_v26 }
  0x43   :  { %622 = vmatmul.mubr.msk.bf16.gmra.mxu0 %vm134_vm0, %v701_v22  ;;  %372 = vmatprep.subr.bf16.mxu1 %v724_v27 }
  0x44   :  { %662 = vmatpush3.bf16.msra.mxu0 %v718_v21 }
  0x45   :  { %663 = vmatprep.subr.bf16.mxu0 %v722_v25 }
  0x46   :  { %373 = vmatpush1.bf16.msra.mxu1 %v727_v29 }
  0x47   :  { %374 = vmatprep.subr.bf16.mxu1 %v728_v30 }
  0x48   :  { %664 = vmatpush3.bf16.msra.mxu0 %v722_v25 }
  0x49   :  { %665 = vmatprep.subr.bf16.mxu0 %v726_v28 }
  0x4a   :  { %375 = vmatpush1.bf16.msra.mxu1 %v731_v32 }
  0x4c   :  { %666 = vmatpush3.bf16.msra.mxu0 %v726_v28 }
  0x4d   :  { %667 = vmatprep.subr.bf16.mxu0 %v730_v31 }
  0x50   :  { %668 = vmatpush3.bf16.msra.mxu0 %v730_v31 }
  0x51   :  { %669 = vmatprep.subr.bf16.mxu0 %v732_v33 }
  0x54   :  { %670 = vmatpush3.bf16.msra.mxu0 %v732_v33 }
  0x55   :  { %671 = vmatprep.subr.bf16.mxu0 %v733_v34 }
  0x58   :  { %672 = vmatpush3.bf16.msra.mxu0 %v733_v34 }
  0xfb   :  { %v175_v42 = vpop.f32.mrf.mxu0 }
  0xfc   :  { %v176_v44 = vadd.f32 %v175_v42, %v77_v40 }
  0xfd   :  { %v177_v43 = vpop.f32.mrf.mxu0 }
  0xfe   :  { %v880_v45 = vadd.f32 %v177_v43, %v81_v41  ;;  %v194_v49 = vmax.f32 %v176_v44, 0.0 }
  0xff   :  { %v179_v46 = vpop.f32.mrf.mxu0 }
 0x100   :  { %v180_v47 = vadd.f32 %v179_v46, %v77_v40 }
 0x101   :  { %v181_v48 = vpop.f32.mrf.mxu0 }
 0x102   :  { %v195_v50 = vmax.f32 %v180_v47, 0.0  ;;  %v182_v51 = vadd.f32 %v181_v48, %v81_v41 }
 0x103   :  { %v185_v52 = vpop.f32.mrf.mxu0 }
 0x104   :  { %v198_v53 = vpack.c.bf16 %v195_v50, %v194_v49  ;;  %v186_v55 = vadd.f32 %v185_v52, %v77_v40 }
 0x105   :  { %v187_v54 = vpop.f32.mrf.mxu0 }
 0x106   :  { %v188_v56 = vadd.f32 %v187_v54, %v81_v41  ;;  %393 = vmatmul.mubr.bf16.vlgmr.msra.gmra.mxu1 %v198_v53  ;;  %673 = vmatprep.mubr.bf16.mxu0 %v198_v53  ;;  %v196_v59 = vmax.f32 %v186_v55, 0.0 }
 0x107   :  { %v189_v57 = vpop.f32.mrf.mxu0  ;;  %402 = vmatprep.mubr.bf16.mxu1 %v829_v0 }
 0x108   :  { %v190_v58 = vadd.f32 %v189_v57, %v77_v40 }
 0x109   :  { %v191_v0 = vpop.f32.mrf.mxu0 }
 0x10a   :  { %v197_v60 = vmax.f32 %v190_v58, 0.0  ;;  %v192_v23 = vadd.f32 %v191_v0, %v81_v41 }
 0x10c   :  { %v199_v61 = vpack.c.bf16 %v197_v60, %v196_v59 }
 0x10e   :  { %403 = vmatmul.mubr.bf16.gmra.mxu1 %v199_v61  ;;  %674 = vmatmul.mubr.bf16.vlgmr.msra.gmra.mxu0 %v199_v61 }
 0x1c6   :  { %v394_v63 = vpop.f32.mrf.mxu1 }
 0x1c7   :  { %v515_v15 = vrot.slane %v394_v63, 7 }
 0x1c8   :  { %v396_v2 = vpop.f32.mrf.mxu1 }
 0x1ca   :  { %v398_v5 = vpop.f32.mrf.mxu1 }
 0x1cb   :  { %v516_v11 = vrot.slane %v398_v5, 7 }
 0x1cc   :  { %v400_v8 = vpop.f32.mrf.mxu1 }
 0x1cd   :  { %v522_v21 = vsel %vm519_vm1, %v515_v15, %v516_v11 }
 0x1ce   :  { %v404_v12 = vpop.f32.mrf.mxu1  ;;  %v675_v13 = vpop.f32.mrf.mxu0  ;;  %v545_v31 = vadd.f32 %v522_v21, %v182_v51 }
 0x1cf   :  { %v517_v16 = vrot.slane %v404_v12, 7  ;;  %v554_v27 = vrot.slane %v675_v13, 1 }
 0x1d0   :  { %v406_v17 = vpop.f32.mrf.mxu1  ;;  %v447_v18 = vpop.f32.mrf.mxu0  ;;  %v549_v47 = vadd.f32 %v545_v31, %v400_v8 }
 0x1d1   :  { %v521_v22 = vsel %vm519_vm1, %v516_v11, %v517_v16  ;;  %v552_v32 = vrot.slane %v447_v18, 1 }
 0x1d2   :  { %v542_v24 = vsel %vm530_vm2, %v521_v22, 0.0  ;;  %v408_v25 = vpop.f32.mrf.mxu1  ;;  %v676_v26 = vpop.f32.mrf.mxu0 }
 0x1d3   :  { %v546_v28 = vadd.f32 %v542_v24, %v188_v56  ;;  %v518_v29 = vrot.slane %v408_v25, 7  ;;  %v555_v30 = vrot.slane %v676_v26, 1 }
 0x1d4   :  { %v450_v33 = vpop.f32.mrf.mxu0  ;;  %v410_v46 = vpop.f32.mrf.mxu1 }
 0x1d5   :  { %v550_v34 = vadd.f32 %v546_v28, %v406_v17  ;;  %v523_v35 = vsel %vm519_vm1, %v518_v29, %v515_v15  ;;  %v557_v37 = vsel %vm556_vm4, %v554_v27, %v555_v30  ;;  %v520_v38 = vsel %vm519_vm1, %v517_v16, %v518_v29 }
 0x1d6   :  { %v540_v39 = vsel %vm528_vm3, %v523_v35, 0.0  ;;  %v547_v40 = vadd.f32 %v520_v38, %v192_v23  ;;  %v560_v41 = vsel %vm556_vm4, %v555_v30, %v552_v32  ;;  %v553_v42 = vrot.slane %v450_v33, 1 }
 0x1d7   :  { %v544_v43 = vadd.f32 %v540_v39, %v880_v45  ;;  %v583_v44 = vadd.f32 %v557_v37, %v550_v34  ;;  %v580_v51 = vsel %vm572_vm5, %v560_v41, 0.0 }
 0x1d8   :  { %v551_v48 = vadd.f32 %v547_v40, %v410_v46  ;;  %v558_v49 = vsel %vm556_vm4, %v553_v42, %v554_v27  ;;  %v559_v55 = vsel %vm556_vm4, %v552_v32, %v553_v42 }
 0x1d9   :  { %v587_v50 = vmax.f32 %v583_v44, 0.0  ;;  %v548_v52 = vadd.f32 %v544_v43, %v396_v2  ;;  %v578_v53 = vsel %vm570_vm6, %v558_v49, 0.0 }
 0x1da   :  { %v584_v54 = vadd.f32 %v580_v51, %v551_v48  ;;  %v582_v56 = vadd.f32 %v578_v53, %v549_v47 }
 0x1db   :  { %591 = vst [vmem:[#allocation8 + $0x10] sm:$0xff] %v587_v50  ;;  %v581_v45 = vadd.f32 %v559_v55, %v548_v52 }
 0x1dc   :  { %v588_v57 = vmax.f32 %v584_v54, 0.0  ;;  %v586_v58 = vmax.f32 %v582_v56, 0.0 }
 0x1dd   :  { %v585_v59 = vmax.f32 %v581_v45, 0.0 }
 0x1de   :  { %592 = vst [vmem:[#allocation8 + $0x18] sm:$0xff] %v588_v57  ;;  %590 = vst [vmem:[#allocation8 + $0x8] sm:$0xff] %v586_v58 }
 0x1df   :  { %589 = vst [vmem:[#allocation8] sm:$0xff] %v585_v59 }
 0x1e0   :  { %805 = shalt.err (!%p802_p5)
}
 0x1e1   :  { %604 = dma.vmem_to_hbm [thread:$0]  %s599_s9, 512, %s919_s4, [#allocation4], %s821_s18, %s821_s18, %s822_s19  }
 0x1e2   :  { %818 = dma.done.wait [#allocation4], 512  }
 0x1e3   :  { %819 = vsyncadd [#allocation4], 4294966784 }
 0x1e4   :  { %608 = vsyncpa [#allocation3], 1 }
 0x1e5   :  { %609 = vsyncpa [#allocation6], 1 }
 0x1e6   :  { %610 = vsyncpa [#allocation4], 1 }

</bundles_post_ra>
